<compile_context>
chip_gen: v7x
topology: tpu7x:2x2x1
jax: 0.10.0
libtpu: 0.0.40
codegen_flags: <defaults>
</compile_context>

<pallas_src>
import jax
import jax.numpy as jnp
from jax.experimental import pallas as pl
from jax.experimental.pallas import tpu as pltpu


HIDDEN = 256
LANE = 128
SUBLANE = 8


def _round_up(x, m):
    return ((x + m - 1) // m) * m


def policy_mlp_kernel(x_ref, w1_ref, b1_ref, w2_ref, b2_ref, w3_ref, b3_ref,
                      o_ref, h1_ref, h2_ref):
    """Entire 3-layer MLP hot path: 3 MXU matmuls (bf16 in, f32 acc) + bias + ReLU."""
    # Layer 1: (tile, K_pad) @ (K_pad, 256). Bias + ReLU in f32, then stage the
    # activation in bf16 VMEM scratch (halves vreg/VMEM pressure, feeds MXU bf16).
    h1 = jnp.dot(x_ref[...], w1_ref[...], preferred_element_type=jnp.float32)
    h1_ref[...] = jnp.maximum(h1 + b1_ref[...], 0.0).astype(h1_ref.dtype)

    # Layer 2: (tile, 256) @ (256, 256)
    h2 = jnp.dot(h1_ref[...], w2_ref[...], preferred_element_type=jnp.float32)
    h2_ref[...] = jnp.maximum(h2 + b2_ref[...], 0.0).astype(h2_ref.dtype)

    # Layer 3: (tile, 256) @ (256, N_pad=128) -> lane-dense, unmasked store.
    out = jnp.dot(h2_ref[...], w3_ref[...], preferred_element_type=jnp.float32)
    o_ref[...] = (out + b3_ref[...]).astype(o_ref.dtype)


def policy_forward(x, params, *, batch_tile=256, compute_dtype=jnp.bfloat16):
    """Runs the PolicyNetwork forward pass via pallas_call.

    x:      (B, obs_dim) float32
    params: dict with w1 (obs_dim,256), b1 (1,256), w2 (256,256), b2 (1,256),
            w3 (256,out_dim), b3 (1,out_dim)   [W stored as (in, out), y = x@W + b]
    """
    w1, b1 = params["w1"], params["b1"]
    w2, b2 = params["w2"], params["b2"]
    w3, b3 = params["w3"], params["b3"]

    B, obs_dim = x.shape
    out_dim = w3.shape[1]

    # Pad K (obs_dim) and the final N (out_dim) to full 128-lane slabs.
    k_pad = max(LANE, _round_up(obs_dim, LANE))
    n_pad = max(LANE, _round_up(out_dim, LANE))

    # Batch tile: use the requested (large) tile when the batch supports it,
    # otherwise shrink to the (sublane-aligned) padded batch. No hard asserts.
    tile = min(batch_tile, max(SUBLANE, _round_up(B, SUBLANE)))
    b_pad = _round_up(B, tile)
    grid = (b_pad // tile,)   # on v7x, >=2 steps shards across both TensorCores

    cd = compute_dtype
    # Zero-padded, bf16-cast inputs / weights; biases stay f32.
    x_p = jnp.zeros((b_pad, k_pad), cd).at[:B, :obs_dim].set(x.astype(cd))
    w1_p = jnp.zeros((k_pad, HIDDEN), cd).at[:obs_dim, :].set(w1.astype(cd))
    w2_p = w2.astype(cd)
    w3_p = jnp.zeros((HIDDEN, n_pad), cd).at[:, :out_dim].set(w3.astype(cd))
    b1_p = b1.astype(jnp.float32)
    b2_p = b2.astype(jnp.float32)
    b3_p = jnp.zeros((1, n_pad), jnp.float32).at[:, :out_dim].set(
        b3.astype(jnp.float32))

    # Weights/biases: constant index_map -> fetched once, resident every step.
    full = lambda shape: pl.BlockSpec(shape, lambda i: (0, 0))

    out_padded = pl.pallas_call(
        policy_mlp_kernel,
        out_shape=jax.ShapeDtypeStruct((b_pad, n_pad), x.dtype),
        grid_spec=pltpu.PrefetchScalarGridSpec(
            num_scalar_prefetch=0,
            grid=grid,
            in_specs=[
                pl.BlockSpec((tile, k_pad), lambda i: (i, 0)),  # x tile
                full(w1_p.shape), full(b1_p.shape),
                full(w2_p.shape), full(b2_p.shape),
                full(w3_p.shape), full(b3_p.shape),
            ],
            out_specs=pl.BlockSpec((tile, n_pad), lambda i: (i, 0)),
            scratch_shapes=[
                pltpu.VMEM((tile, HIDDEN), cd),   # h1 staging
                pltpu.VMEM((tile, HIDDEN), cd),   # h2 staging
            ],
        ),
        compiler_params=pltpu.CompilerParams(
            dimension_semantics=("parallel",)),
    )(x_p, w1_p, b1_p, w2_p, b2_p, w3_p, b3_p)

    return out_padded[:B, :out_dim]


def init_params(key, obs_dim, out_dim):
    """Deterministic synthetic init (PyTorch-Linear-style uniform bounds)."""
    ks = jax.random.split(key, 6)

    def lin(kw, kb, fan_in, fan_out):
        bound = 1.0 / jnp.sqrt(fan_in)
        w = jax.random.uniform(kw, (fan_in, fan_out), jnp.float32, -bound, bound)
        b = jax.random.uniform(kb, (1, fan_out), jnp.float32, -bound, bound)
        return w, b

    w1, b1 = lin(ks[0], ks[1], obs_dim, HIDDEN)
    w2, b2 = lin(ks[2], ks[3], HIDDEN, HIDDEN)
    w3, b3 = lin(ks[4], ks[5], HIDDEN, out_dim)
    return {"w1": w1, "b1": b1, "w2": w2, "b2": b2, "w3": w3, "b3": b3}


def reference_forward(x, p, dtype=jnp.bfloat16):
    """Pure-JAX reference using the same bf16-in / f32-accumulate path."""
    xd = x.astype(dtype)
    h1 = jnp.maximum(
        jnp.dot(xd, p["w1"].astype(dtype),
                preferred_element_type=jnp.float32) + p["b1"], 0.0).astype(dtype)
    h2 = jnp.maximum(
        jnp.dot(h1, p["w2"].astype(dtype),
                preferred_element_type=jnp.float32) + p["b2"], 0.0).astype(dtype)
    return jnp.dot(h2, p["w3"].astype(dtype),
                   preferred_element_type=jnp.float32) + p["b3"]


# TODO(synk): the `sample()` method uses torch.distributions.Normal noise +
# tanh squashing; only the deterministic forward() hot path is implemented here.

if __name__ == "__main__":
    key = jax.random.PRNGKey(0)
    k_params, k_obs = jax.random.split(key)

    obs_dim = 8        # LunarLanderContinuous observation size
    out_dim = 2        # LunarLanderContinuous action size
    params = init_params(k_params, obs_dim, out_dim)

    # Small batch (exercises tile-shrink path).
    batch = 8
    obs = jax.random.normal(k_obs, (batch, obs_dim), jnp.float32)
    action = jax.block_until_ready(policy_forward(obs, params))
    expected = reference_forward(obs, params)
    assert action.shape == (batch, out_dim)
    assert jnp.allclose(action, expected, atol=5e-2, rtol=5e-2)

    # Non-multiple batch (exercises zero-padding path, still small).
    batch2 = 50
    obs2 = jax.random.normal(jax.random.PRNGKey(1), (batch2, obs_dim), jnp.float32)
    action2 = jax.block_until_ready(policy_forward(obs2, params))
    expected2 = reference_forward(obs2, params)
    assert action2.shape == (batch2, out_dim)
    assert jnp.allclose(action2, expected2, atol=5e-2, rtol=5e-2)

    print("KERNEL_OK")
</pallas_src>

<mosaic_0001>
module attributes {stable_mosaic.version = 11 : i64} {
  func.func @policy_mlp_kernel(%arg0: i32, %arg1: memref<8x128xbf16, #tpu.memory_space<vmem>>, %arg2: memref<128x256xbf16, #tpu.memory_space<vmem>>, %arg3: memref<1x256xf32, #tpu.memory_space<vmem>>, %arg4: memref<256x256xbf16, #tpu.memory_space<vmem>>, %arg5: memref<1x256xf32, #tpu.memory_space<vmem>>, %arg6: memref<256x128xbf16, #tpu.memory_space<vmem>>, %arg7: memref<1x128xf32, #tpu.memory_space<vmem>>, %arg8: memref<8x128xf32, #tpu.memory_space<vmem>>, %arg9: memref<8x256xbf16, #tpu.memory_space<vmem>>, %arg10: memref<8x256xbf16, #tpu.memory_space<vmem>>) attributes {dimension_semantics = [#tpu.dimension_semantics<parallel>], iteration_bounds = array<i64: 1>, scalar_prefetch = 0 : i64, scratch_operands = 2 : i64, tpu.core_type = #tpu.core_type<tc>, window_params = [{transform_indices = @transform_0, window_bounds = array<i64: 8, 128>}, {pipeline_mode = #tpu.pipeline_mode<synchronous>, transform_indices = @transform_1, window_bounds = array<i64: 128, 256>}, {pipeline_mode = #tpu.pipeline_mode<synchronous>, transform_indices = @transform_2, window_bounds = array<i64: 1, 256>}, {pipeline_mode = #tpu.pipeline_mode<synchronous>, transform_indices = @transform_3, window_bounds = array<i64: 256, 256>}, {pipeline_mode = #tpu.pipeline_mode<synchronous>, transform_indices = @transform_4, window_bounds = array<i64: 1, 256>}, {pipeline_mode = #tpu.pipeline_mode<synchronous>, transform_indices = @transform_5, window_bounds = array<i64: 256, 128>}, {pipeline_mode = #tpu.pipeline_mode<synchronous>, transform_indices = @transform_6, window_bounds = array<i64: 1, 128>}, {transform_indices = @transform_7, window_bounds = array<i64: 8, 128>}]} {
    %c0 = arith.constant 0 : index
    %c0_0 = arith.constant 0 : index
    %0 = vector.load %arg1[%c0, %c0_0] : memref<8x128xbf16, #tpu.memory_space<vmem>>, vector<8x128xbf16>
    %c0_1 = arith.constant 0 : index
    %c0_2 = arith.constant 0 : index
    %1 = vector.load %arg2[%c0_1, %c0_2] : memref<128x256xbf16, #tpu.memory_space<vmem>>, vector<128x256xbf16>
    %cst = arith.constant dense<0.000000e+00> : vector<8x256xf32>
    %2 = tpu.matmul %0, %1, %cst {dimension_numbers = #tpu.dot_dimension_numbers<[1], [0], [0], [1], [0, 0, 1, 1], [], []>} : vector<8x128xbf16>, vector<128x256xbf16>, vector<8x256xf32> -> vector<8x256xf32>
    %c0_3 = arith.constant 0 : index
    %c0_4 = arith.constant 0 : index
    %3 = vector.load %arg3[%c0_3, %c0_4] : memref<1x256xf32, #tpu.memory_space<vmem>>, vector<1x256xf32>
    %4 = vector.broadcast %3 : vector<1x256xf32> to vector<8x256xf32>
    %5 = arith.addf %2, %4 : vector<8x256xf32>
    %cst_5 = arith.constant 0.000000e+00 : f32
    %6 = vector.broadcast %cst_5 : f32 to vector<8x256xf32>
    %7 = arith.maximumf %5, %6 : vector<8x256xf32>
    %8 = arith.truncf %7 : vector<8x256xf32> to vector<8x256xbf16>
    %c0_6 = arith.constant 0 : index
    %c0_7 = arith.constant 0 : index
    %9 = vector.load %arg9[%c0_6, %c0_7] : memref<8x256xbf16, #tpu.memory_space<vmem>>, vector<8x256xbf16>
    tpu.vector_store %arg9[%c0_6, %c0_7], %8 {strides = array<i32>} : memref<8x256xbf16, #tpu.memory_space<vmem>>, vector<8x256xbf16>,
    %c0_8 = arith.constant 0 : index
    %c0_9 = arith.constant 0 : index
    %10 = vector.load %arg9[%c0_8, %c0_9] : memref<8x256xbf16, #tpu.memory_space<vmem>>, vector<8x256xbf16>
    %c0_10 = arith.constant 0 : index
    %c0_11 = arith.constant 0 : index
    %11 = vector.load %arg4[%c0_10, %c0_11] : memref<256x256xbf16, #tpu.memory_space<vmem>>, vector<256x256xbf16>
    %cst_12 = arith.constant dense<0.000000e+00> : vector<8x256xf32>
    %12 = tpu.matmul %10, %11, %cst_12 {dimension_numbers = #tpu.dot_dimension_numbers<[1], [0], [0], [1], [0, 0, 1, 1], [], []>} : vector<8x256xbf16>, vector<256x256xbf16>, vector<8x256xf32> -> vector<8x256xf32>
    %c0_13 = arith.constant 0 : index
    %c0_14 = arith.constant 0 : index
    %13 = vector.load %arg5[%c0_13, %c0_14] : memref<1x256xf32, #tpu.memory_space<vmem>>, vector<1x256xf32>
    %14 = vector.broadcast %13 : vector<1x256xf32> to vector<8x256xf32>
    %15 = arith.addf %12, %14 : vector<8x256xf32>
    %cst_15 = arith.constant 0.000000e+00 : f32
    %16 = vector.broadcast %cst_15 : f32 to vector<8x256xf32>
    %17 = arith.maximumf %15, %16 : vector<8x256xf32>
    %18 = arith.truncf %17 : vector<8x256xf32> to vector<8x256xbf16>
    %c0_16 = arith.constant 0 : index
    %c0_17 = arith.constant 0 : index
    %19 = vector.load %arg10[%c0_16, %c0_17] : memref<8x256xbf16, #tpu.memory_space<vmem>>, vector<8x256xbf16>
    tpu.vector_store %arg10[%c0_16, %c0_17], %18 {strides = array<i32>} : memref<8x256xbf16, #tpu.memory_space<vmem>>, vector<8x256xbf16>,
    %c0_18 = arith.constant 0 : index
    %c0_19 = arith.constant 0 : index
    %20 = vector.load %arg10[%c0_18, %c0_19] : memref<8x256xbf16, #tpu.memory_space<vmem>>, vector<8x256xbf16>
    %c0_20 = arith.constant 0 : index
    %c0_21 = arith.constant 0 : index
    %21 = vector.load %arg6[%c0_20, %c0_21] : memref<256x128xbf16, #tpu.memory_space<vmem>>, vector<256x128xbf16>
    %cst_22 = arith.constant dense<0.000000e+00> : vector<8x128xf32>
    %22 = tpu.matmul %20, %21, %cst_22 {dimension_numbers = #tpu.dot_dimension_numbers<[1], [0], [0], [1], [0, 0, 1, 1], [], []>} : vector<8x256xbf16>, vector<256x128xbf16>, vector<8x128xf32> -> vector<8x128xf32>
    %c0_23 = arith.constant 0 : index
    %c0_24 = arith.constant 0 : index
    %23 = vector.load %arg7[%c0_23, %c0_24] : memref<1x128xf32, #tpu.memory_space<vmem>>, vector<1x128xf32>
    %24 = vector.broadcast %23 : vector<1x128xf32> to vector<8x128xf32>
    %25 = arith.addf %22, %24 : vector<8x128xf32>
    %c0_25 = arith.constant 0 : index
    %c0_26 = arith.constant 0 : index
    %26 = vector.load %arg8[%c0_25, %c0_26] : memref<8x128xf32, #tpu.memory_space<vmem>>, vector<8x128xf32>
    tpu.vector_store %arg8[%c0_25, %c0_26], %25 {strides = array<i32>} : memref<8x128xf32, #tpu.memory_space<vmem>>, vector<8x128xf32>,
    return
  }
  func.func @transform_0(%arg0: i32) -> (i32, i32) {
    %c0_i32 = arith.constant 0 : i32
    %c0_i32_0 = arith.constant 0 : i32
    return %arg0, %c0_i32 : i32, i32
  }
  func.func @transform_1(%arg0: i32) -> (i32, i32) {
    %c0_i32 = arith.constant 0 : i32
    %c0_i32_0 = arith.constant 0 : i32
    %c0_i32_1 = arith.constant 0 : i32
    return %c0_i32, %c0_i32_0 : i32, i32
  }
  func.func @transform_2(%arg0: i32) -> (i32, i32) {
    %c0_i32 = arith.constant 0 : i32
    %c0_i32_0 = arith.constant 0 : i32
    %c0_i32_1 = arith.constant 0 : i32
    return %c0_i32, %c0_i32_0 : i32, i32
  }
  func.func @transform_3(%arg0: i32) -> (i32, i32) {
    %c0_i32 = arith.constant 0 : i32
    %c0_i32_0 = arith.constant 0 : i32
    %c0_i32_1 = arith.constant 0 : i32
    return %c0_i32, %c0_i32_0 : i32, i32
  }
  func.func @transform_4(%arg0: i32) -> (i32, i32) {
    %c0_i32 = arith.constant 0 : i32
    %c0_i32_0 = arith.constant 0 : i32
    %c0_i32_1 = arith.constant 0 : i32
    return %c0_i32, %c0_i32_0 : i32, i32
  }
  func.func @transform_5(%arg0: i32) -> (i32, i32) {
    %c0_i32 = arith.constant 0 : i32
    %c0_i32_0 = arith.constant 0 : i32
    %c0_i32_1 = arith.constant 0 : i32
    return %c0_i32, %c0_i32_0 : i32, i32
  }
  func.func @transform_6(%arg0: i32) -> (i32, i32) {
    %c0_i32 = arith.constant 0 : i32
    %c0_i32_0 = arith.constant 0 : i32
    %c0_i32_1 = arith.constant 0 : i32
    return %c0_i32, %c0_i32_0 : i32, i32
  }
  func.func @transform_7(%arg0: i32) -> (i32, i32) {
    %c0_i32 = arith.constant 0 : i32
    %c0_i32_0 = arith.constant 0 : i32
    return %arg0, %c0_i32 : i32, i32
  }
}

</mosaic_0001>

<bundles_post_ra>
// kernel: tpu_custom_call.1
= control target key start
LH: loop header
LB: loop body
LE: loop exit
PB: predicated region body
PF: predicated region fallthrough
CT: control target
= control target key end

     0   :  { %12 = vsyncpa [#allocation5], 0  ;;  %s1147_s0 = inlined_call_operand.hbm [shape: bf16[8,128], index: 0, kind: input, shape index: {}]   ;;  %s1148_s1 = inlined_call_operand.hbm [shape: bf16[128,256], index: 1, kind: input, shape index: {}]   ;;  %s1149_s2 = inlined_call_operand.vmem [shape: f32[1,256], index: 2, kind: input, shape index: {}]   ;;  %s1150_s3 = inlined_call_operand.hbm [shape: bf16[256,256], index: 3, kind: input, shape index: {}]   ;;  %s1151_s4 = inlined_call_operand.vmem [shape: f32[1,256], index: 4, kind: input, shape index: {}]   ;;  %s1152_s5 = inlined_call_operand.hbm [shape: bf16[256,128], index: 5, kind: input, shape index: {}]   ;;  %s1153_s6 = inlined_call_operand.vmem [shape: f32[1,128], index: 6, kind: input, shape index: {}]   ;;  %s1154_s7 = inlined_call_operand.hbm [shape: f32[8,128], index: 7, kind: output, shape index: {}]  }
   0x1   :  { %13 = vsyncpa [#allocation8], 0 }
   0x2   :  { %14 = vsyncpa [#allocation11], 0 }
   0x3   :  { %15 = vsyncpa [#allocation6], 0  ;;  %s1022_s24 = smov [#allocation7]   ;;  %s904_s28 = scalar_lea.hbm %s1148_s1, 2048 }
   0x4   :  { %s31_s25 = sshll.u32 %s1022_s24, 4  ;;  %p905_p0 = scmp.ne.s32.totalorder %s1148_s1, %s904_s28  ;;  %s32_s25 = int_to_ptr.vmem [resolvable:$true] %s31_s25 }
   0x5   :  { %p908_p1 = scmp.lt.u32.totalorder %s904_s28, %s1148_s1 }
   0x7   :  { %p910_p2 = pnand %p908_p1, %p905_p0 }
   0x9   :  { %913 = shalt.err (!%p910_p2)
}
   0xa   :  { %s914_s10 = scalar_lea.vmem %s32_s25, 2048  ;;  %p919_p4 = scmp.lt.s32.totalorder %s32_s25, %s32_s25 }
   0xb   :  { %p915_p3 = scmp.ne.s32.totalorder %s32_s25, %s914_s10  ;;  %p920_p5 = scmp.lt.s32.totalorder %s914_s10, %s914_s10 }
   0xd   :  { %p921_p6 = por %p920_p5, %p919_p4 }
   0xf   :  { %p922_p7 = pnand %p921_p6, %p915_p3 }
  0x11   :  { %925 = shalt.err (!%p922_p7)
}
  0x12   :  { %s1023_s11 = smov 128   ;;  %s1024_s12 = smov 8  }
  0x13   :  { %37 = dma.hbm_to_vmem [thread:$0]  %s1148_s1, 2048, %s32_s25, [#allocation8], %s1023_s11, %s1023_s11, %s1024_s12  }
  0x14   :  { %s1025_s15 = smov [#allocation4]   ;;  %s1026_s17 = smov [#allocation9]  }
  0x15   :  { %s22_s16 = sshll.u32 %s1025_s15, 4  ;;  %s45_s18 = sshll.u32 %s1026_s17, 4  ;;  %s23_s16 = int_to_ptr.vmem [resolvable:$true] %s22_s16  ;;  %s46_s18 = int_to_ptr.vmem [resolvable:$true] %s45_s18 }
  0x16   :  { %s926_s21 = scalar_lea.hbm %s1147_s0, 64 }
  0x17   :  { %p927_p8 = scmp.ne.s32.totalorder %s1147_s0, %s926_s21  ;;  %p930_p9 = scmp.lt.u32.totalorder %s926_s21, %s1147_s0 }
  0x19   :  { %p932_p10 = pnand %p930_p9, %p927_p8 }
  0x1b   :  { %935 = shalt.err (!%p932_p10)
}
  0x1c   :  { %s936_s1 = scalar_lea.vmem %s23_s16, 64  ;;  %p941_p12 = scmp.lt.s32.totalorder %s23_s16, %s23_s16 }
  0x1d   :  { %p937_p11 = scmp.ne.s32.totalorder %s23_s16, %s936_s1  ;;  %p942_p13 = scmp.lt.s32.totalorder %s936_s1, %s936_s1 }
  0x1f   :  { %p943_p0 = por %p942_p13, %p941_p12 }
  0x21   :  { %p944_p1 = pnand %p943_p0, %p937_p11 }
  0x23   :  { %947 = shalt.err (!%p944_p1)
}
  0x24   :  { %25 = dma.hbm_to_vmem [thread:$0]  %s1147_s0, 64, %s23_s16, [#allocation5]  }
  0x25   :  { %s948_s30 = scalar_lea.hbm %s1150_s3, 4096 }
  0x26   :  { %p949_p2 = scmp.ne.s32.totalorder %s1150_s3, %s948_s30  ;;  %p952_p3 = scmp.lt.u32.totalorder %s948_s30, %s1150_s3 }
  0x28   :  { %p954_p4 = pnand %p952_p3, %p949_p2 }
  0x2a   :  { %957 = shalt.err (!%p954_p4)
}
  0x2b   :  { %s958_s14 = scalar_lea.vmem %s46_s18, 4096  ;;  %p963_p6 = scmp.lt.s32.totalorder %s46_s18, %s46_s18 }
  0x2c   :  { %p959_p5 = scmp.ne.s32.totalorder %s46_s18, %s958_s14  ;;  %p964_p7 = scmp.lt.s32.totalorder %s958_s14, %s958_s14 }
  0x2e   :  { %p965_p8 = por %p964_p7, %p963_p6 }
  0x30   :  { %p966_p9 = pnand %p965_p8, %p959_p5 }
  0x32   :  { %969 = shalt.err (!%p966_p9)
}
  0x33   :  { %51 = dma.hbm_to_vmem [thread:$0]  %s1150_s3, 4096, %s46_s18, [#allocation8], %s1023_s11, %s1023_s11, %s1024_s12  }
  0x34   :  { %s1027_s16 = smov [#allocation10]   ;;  %s970_s21 = scalar_lea.hbm %s1152_s5, 2048 }
  0x35   :  { %s59_s17 = sshll.u32 %s1027_s16, 4  ;;  %p971_p10 = scmp.ne.s32.totalorder %s1152_s5, %s970_s21  ;;  %s60_s17 = int_to_ptr.vmem [resolvable:$true] %s59_s17 }
  0x36   :  { %p974_p11 = scmp.lt.u32.totalorder %s970_s21, %s1152_s5 }
  0x38   :  { %p976_p12 = pnand %p974_p11, %p971_p10 }
  0x3a   :  { %979 = shalt.err (!%p976_p12)
}
  0x3b   :  { %s980_s1 = scalar_lea.vmem %s60_s17, 2048  ;;  %p985_p0 = scmp.lt.s32.totalorder %s60_s17, %s60_s17 }
  0x3c   :  { %p981_p13 = scmp.ne.s32.totalorder %s60_s17, %s980_s1  ;;  %p986_p1 = scmp.lt.s32.totalorder %s980_s1, %s980_s1 }
  0x3e   :  { %p987_p2 = por %p986_p1, %p985_p0 }
  0x40   :  { %p988_p3 = pnand %p987_p2, %p981_p13 }
  0x42   :  { %991 = shalt.err (!%p988_p3)
}
  0x43   :  { %s1028_s3 = smov 64   ;;  %s1029_s11 = smov 4  }
  0x44   :  { %65 = dma.hbm_to_vmem [thread:$0]  %s1152_s5, 2048, %s60_s17, [#allocation11], %s1028_s3, %s1028_s3, %s1029_s11  }
  0x45   :  { %1014 = dma.done.wait [#allocation5], 64  }
  0x46   :  { %1015 = vsyncadd [#allocation5], 4294967232 }
  0x47   :  { %1016 = dma.done.wait [#allocation8], 6144  }
  0x48   :  { %1017 = vsyncadd [#allocation8], 4294961152 }
  0x49   :  { %1018 = dma.done.wait [#allocation11], 2048  }
  0x4a   :  { %1019 = vsyncadd [#allocation11], 4294965248  ;;  %v1030_v0 = vmov 0   ;;  %v816_v1 = vld [vmem:[#allocation7 + $0x4] ss:$8 sps:$4 sm:$0xff]   ;;  %v892_v54 = vld [vmem:[#allocation10 + $0x50] sm:$0xff]   ;;  %v100_v62 = vlaneseq }
  0x4b   :  { %222 = vmatprep.mubr.bf16.mxu0 %v1030_v0  ;;  %v818_v2 = vld [vmem:[#allocation7] ss:$8 sps:$4 sm:$0xff]   ;;  %190 = vmatprep.subr.bf16.mxu0 %v816_v1  ;;  %v819_v3 = vld [vmem:[#allocation7 + $0x14] ss:$8 sps:$4 sm:$0xff]   ;;  %v821_v4 = vld [vmem:[#allocation7 + $0x10] ss:$8 sps:$4 sm:$0xff]  }
  0x4c   :  { %191 = vmatpush1.bf16.msra.mxu0 %v818_v2  ;;  %v822_v5 = vld [vmem:[#allocation7 + $0x24] ss:$8 sps:$4 sm:$0xff]   ;;  %v824_v6 = vld [vmem:[#allocation7 + $0x20] ss:$8 sps:$4 sm:$0xff]   ;;  %v825_v7 = vld [vmem:[#allocation7 + $0x34] ss:$8 sps:$4 sm:$0xff]  }
  0x4d   :  { %192 = vmatprep.subr.bf16.mxu0 %v819_v3  ;;  %v827_v8 = vld [vmem:[#allocation7 + $0x30] ss:$8 sps:$4 sm:$0xff]   ;;  %v828_v9 = vld [vmem:[#allocation7 + $0x44] ss:$8 sps:$4 sm:$0xff]   ;;  %v842_v11 = vld [vmem:[#allocation9] ss:$8 sps:$4 sm:$0xff]  }
  0x4e   :  { %v840_v10 = vld [vmem:[#allocation9 + $0x4] ss:$8 sps:$4 sm:$0xff]   ;;  %v843_v12 = vld [vmem:[#allocation9 + $0x14] ss:$8 sps:$4 sm:$0xff]   ;;  %v830_v13 = vld [vmem:[#allocation7 + $0x40] ss:$8 sps:$4 sm:$0xff]  }
  0x4f   :  { %454 = vmatprep.subr.bf16.mxu1 %v840_v10  ;;  %v845_v14 = vld [vmem:[#allocation9 + $0x10] ss:$8 sps:$4 sm:$0xff]   ;;  %v846_v15 = vld [vmem:[#allocation9 + $0x24] ss:$8 sps:$4 sm:$0xff]   ;;  %v831_v16 = vld [vmem:[#allocation7 + $0x54] ss:$8 sps:$4 sm:$0xff]  }
  0x50   :  { %193 = vmatpush1.bf16.msra.mxu0 %v821_v4  ;;  %455 = vmatpush1.bf16.msra.mxu1 %v842_v11  ;;  %v833_v17 = vld [vmem:[#allocation7 + $0x50] ss:$8 sps:$4 sm:$0xff]   ;;  %v848_v18 = vld [vmem:[#allocation9 + $0x20] ss:$8 sps:$4 sm:$0xff]   ;;  %v849_v19 = vld [vmem:[#allocation9 + $0x34] ss:$8 sps:$4 sm:$0xff]  }
  0x51   :  { %194 = vmatprep.subr.bf16.mxu0 %v822_v5  ;;  %456 = vmatprep.subr.bf16.mxu1 %v843_v12  ;;  %v834_v20 = vld [vmem:[#allocation7 + $0x64] ss:$8 sps:$4 sm:$0xff]   ;;  %v836_v21 = vld [vmem:[#allocation7 + $0x60] ss:$8 sps:$4 sm:$0xff]   ;;  %v851_v22 = vld [vmem:[#allocation9 + $0x30] ss:$8 sps:$4 sm:$0xff]  }
  0x52   :  { %v852_v23 = vld [vmem:[#allocation9 + $0x44] ss:$8 sps:$4 sm:$0xff]   ;;  %v837_v24 = vld [vmem:[#allocation7 + $0x74] ss:$8 sps:$4 sm:$0xff]   ;;  %v839_v25 = vld [vmem:[#allocation7 + $0x70] ss:$8 sps:$4 sm:$0xff]  }
  0x53   :  { %v854_v26 = vld [vmem:[#allocation9 + $0x40] ss:$8 sps:$4 sm:$0xff]   ;;  %v855_v27 = vld [vmem:[#allocation9 + $0x54] ss:$8 sps:$4 sm:$0xff]   ;;  %v857_v29 = vld [vmem:[#allocation9 + $0x50] ss:$8 sps:$4 sm:$0xff]  }
  0x54   :  { %195 = vmatpush1.bf16.msra.mxu0 %v824_v6  ;;  %457 = vmatpush1.bf16.msra.mxu1 %v845_v14  ;;  %v81_v28 = vld [vmem:[#allocation4] sm:$0xf]  ;;  %v858_v30 = vld [vmem:[#allocation9 + $0x64] ss:$8 sps:$4 sm:$0xff]   ;;  %v860_v31 = vld [vmem:[#allocation9 + $0x60] ss:$8 sps:$4 sm:$0xff]  }
  0x55   :  { %196 = vmatprep.subr.bf16.mxu0 %v825_v7  ;;  %458 = vmatprep.subr.bf16.mxu1 %v846_v15  ;;  %v861_v32 = vld [vmem:[#allocation9 + $0x74] ss:$8 sps:$4 sm:$0xff]   ;;  %v863_v33 = vld [vmem:[#allocation9 + $0x70] ss:$8 sps:$4 sm:$0xff]   ;;  %v864_v34 = vld [vmem:[#allocation9 + $0x84] ss:$8 sps:$4 sm:$0xff]  }
  0x56   :  { %v866_v35 = vld [vmem:[#allocation9 + $0x80] ss:$8 sps:$4 sm:$0xff]   ;;  %v867_v36 = vld [vmem:[#allocation9 + $0x94] ss:$8 sps:$4 sm:$0xff]   ;;  %v869_v37 = vld [vmem:[#allocation9 + $0x90] ss:$8 sps:$4 sm:$0xff]  }
  0x57   :  { %v870_v38 = vld [vmem:[#allocation9 + $0xa4] ss:$8 sps:$4 sm:$0xff]   ;;  %v872_v39 = vld [vmem:[#allocation9 + $0xa0] ss:$8 sps:$4 sm:$0xff]   ;;  %v873_v40 = vld [vmem:[#allocation9 + $0xb4] ss:$8 sps:$4 sm:$0xff]  }
  0x58   :  { %197 = vmatpush1.bf16.msra.mxu0 %v827_v8  ;;  %459 = vmatpush1.bf16.msra.mxu1 %v848_v18  ;;  %v875_v41 = vld [vmem:[#allocation9 + $0xb0] ss:$8 sps:$4 sm:$0xff]   ;;  %v876_v42 = vld [vmem:[#allocation9 + $0xc4] ss:$8 sps:$4 sm:$0xff]   ;;  %v878_v43 = vld [vmem:[#allocation9 + $0xc0] ss:$8 sps:$4 sm:$0xff]  }
  0x59   :  { %198 = vmatprep.subr.bf16.mxu0 %v828_v9  ;;  %460 = vmatprep.subr.bf16.mxu1 %v849_v19  ;;  %v879_v44 = vld [vmem:[#allocation9 + $0xd4] ss:$8 sps:$4 sm:$0xff]   ;;  %v881_v45 = vld [vmem:[#allocation9 + $0xd0] ss:$8 sps:$4 sm:$0xff]   ;;  %v882_v46 = vld [vmem:[#allocation9 + $0xe4] ss:$8 sps:$4 sm:$0xff]  }
  0x5a   :  { %v884_v47 = vld [vmem:[#allocation9 + $0xe0] ss:$8 sps:$4 sm:$0xff]   ;;  %v885_v48 = vld [vmem:[#allocation9 + $0xf4] ss:$8 sps:$4 sm:$0xff]   ;;  %v887_v49 = vld [vmem:[#allocation9 + $0xf0] ss:$8 sps:$4 sm:$0xff]  }
  0x5b   :  { %v888_v50 = vld [vmem:[#allocation10 + $0x40] sm:$0xff]   ;;  %v890_v52 = vld [vmem:[#allocation10 + $0x48] sm:$0xff]   ;;  %v893_v55 = vld [vmem:[#allocation10 + $0x10] sm:$0xff]   ;;  %v101_v63 = vshrl.u32 %v100_v62, 7 }
  0x5c   :  { %199 = vmatpush1.bf16.msra.mxu0 %v830_v13  ;;  %461 = vmatpush1.bf16.msra.mxu1 %v851_v22  ;;  %v889_v51 = vld [vmem:[#allocation10] sm:$0xff]   ;;  %v891_v53 = vld [vmem:[#allocation10 + $0x8] sm:$0xff]   ;;  %v894_v56 = vld [vmem:[#allocation10 + $0x58] sm:$0xff]  }
  0x5d   :  { %200 = vmatprep.subr.bf16.mxu0 %v831_v16  ;;  %462 = vmatprep.subr.bf16.mxu1 %v852_v23  ;;  %v895_v57 = vld [vmem:[#allocation10 + $0x18] sm:$0xff]   ;;  %v896_v58 = vld [vmem:[#allocation10 + $0x60] sm:$0xff]   ;;  %v898_v60 = vld [vmem:[#allocation10 + $0x68] sm:$0xff]   ;;  %v102_v0 = vsub.s32 0, %v101_v63  ;;  %v106_v2 = vsub.s32 1, %v101_v63 }
  0x5e   :  { %v897_v59 = vld [vmem:[#allocation10 + $0x20] sm:$0xff]   ;;  %v899_v61 = vld [vmem:[#allocation10 + $0x28] sm:$0xff]   ;;  %v98_v1 = vld [vmem:[%s1149_s2] sm:$0x3] }
  0x5f   :  { %v103_v3 = vrot.slane %v98_v1, %v102_v0  ;;  %v107_v4 = vrot.slane %v98_v1, %v106_v2  ;;  %v900_v15 = vld [vmem:[#allocation10 + $0x70] sm:$0xff]   ;;  %v903_v18 = vld [vmem:[#allocation10 + $0x38] sm:$0xff]  }
  0x60   :  { %201 = vmatpush1.bf16.msra.mxu0 %v833_v17  ;;  %463 = vmatpush1.bf16.msra.mxu1 %v854_v26  ;;  %v901_v16 = vld [vmem:[#allocation10 + $0x30] sm:$0xff]   ;;  %v902_v17 = vld [vmem:[#allocation10 + $0x78] sm:$0xff]  }
  0x61   :  { %202 = vmatprep.subr.bf16.mxu0 %v834_v20  ;;  %464 = vmatprep.subr.bf16.mxu1 %v855_v27  ;;  %v275_v19 = vld [vmem:[%s1151_s4] sm:$0x3]  ;;  %s1031_s4 = smov [#allocation12]  }
  0x62   :  { %v280_v20 = vrot.slane %v275_v19, %v102_v0  ;;  %s696_s30 = sshll.u32 %s1031_s4, 4  ;;  %s697_s30 = int_to_ptr.vmem [resolvable:$true] %s696_s30 }
  0x63   :  { %s992_s8 = scalar_lea.vmem %s697_s30, 128  ;;  %p997_p5 = scmp.lt.s32.totalorder %s697_s30, %s697_s30 }
  0x64   :  { %203 = vmatpush1.bf16.msra.mxu0 %v836_v21  ;;  %465 = vmatpush1.bf16.msra.mxu1 %v857_v29  ;;  %v284_v21 = vrot.slane %v275_v19, %v106_v2  ;;  %p993_p4 = scmp.ne.s32.totalorder %s697_s30, %s992_s8  ;;  %p998_p6 = scmp.lt.s32.totalorder %s992_s8, %s992_s8 }
  0x65   :  { %204 = vmatprep.subr.bf16.mxu0 %v837_v24  ;;  %466 = vmatprep.subr.bf16.mxu1 %v858_v30 }
  0x66   :  { %p999_p7 = por %p998_p6, %p997_p5 }
  0x68   :  { %205 = vmatpush1.bf16.msra.mxu0 %v839_v25  ;;  %467 = vmatpush1.bf16.msra.mxu1 %v860_v31  ;;  %p1000_p8 = pnand %p999_p7, %p993_p4 }
  0x69   :  { %468 = vmatprep.subr.bf16.mxu1 %v861_v32  ;;  %784 = vmatprep.subr.bf16.mxu0 %v888_v50 }
  0x6b   :  { %223 = vmatmul.mubr.bf16.vlgmr.msra.gmra.mrb[0].mxu0 %v81_v28 }
  0x6c   :  { %469 = vmatpush1.bf16.msra.mxu1 %v863_v33  ;;  %785 = vmatpush3.bf16.msra.mxu0 %v889_v51  ;;  %v759_v33 = vld [vmem:[%s1153_s6] ss:$0 sm:$0xff] }
  0x6d   :  { %470 = vmatprep.subr.bf16.mxu1 %v864_v34  ;;  %786 = vmatprep.subr.bf16.mxu0 %v890_v52 }
  0x70   :  { %471 = vmatpush1.bf16.msra.mxu1 %v866_v35  ;;  %787 = vmatpush3.bf16.msra.mxu0 %v891_v53 }
  0x71   :  { %472 = vmatprep.subr.bf16.mxu1 %v867_v36  ;;  %788 = vmatprep.subr.bf16.mxu0 %v892_v54 }
  0x74   :  { %473 = vmatpush1.bf16.msra.mxu1 %v869_v37  ;;  %789 = vmatpush3.bf16.msra.mxu0 %v893_v55 }
  0x75   :  { %474 = vmatprep.subr.bf16.mxu1 %v870_v38  ;;  %790 = vmatprep.subr.bf16.mxu0 %v894_v56 }
  0x78   :  { %475 = vmatpush1.bf16.msra.mxu1 %v872_v39  ;;  %791 = vmatpush3.bf16.msra.mxu0 %v895_v57 }
  0x79   :  { %476 = vmatprep.subr.bf16.mxu1 %v873_v40  ;;  %792 = vmatprep.subr.bf16.mxu0 %v896_v58 }
  0x7c   :  { %477 = vmatpush1.bf16.msra.mxu1 %v875_v41  ;;  %793 = vmatpush3.bf16.msra.mxu0 %v897_v59 }
  0x7d   :  { %478 = vmatprep.subr.bf16.mxu1 %v876_v42  ;;  %794 = vmatprep.subr.bf16.mxu0 %v898_v60 }
  0x80   :  { %479 = vmatpush1.bf16.msra.mxu1 %v878_v43  ;;  %795 = vmatpush3.bf16.msra.mxu0 %v899_v61 }
  0x81   :  { %480 = vmatprep.subr.bf16.mxu1 %v879_v44  ;;  %796 = vmatprep.subr.bf16.mxu0 %v900_v15 }
  0x84   :  { %481 = vmatpush1.bf16.msra.mxu1 %v881_v45  ;;  %797 = vmatpush3.bf16.msra.mxu0 %v901_v16 }
  0x85   :  { %482 = vmatprep.subr.bf16.mxu1 %v882_v46  ;;  %798 = vmatprep.subr.bf16.mxu0 %v902_v17 }
  0x88   :  { %483 = vmatpush1.bf16.msra.mxu1 %v884_v47  ;;  %799 = vmatpush3.bf16.msra.mxu0 %v903_v18 }
  0x89   :  { %484 = vmatprep.subr.bf16.mxu1 %v885_v48 }
  0x8c   :  { %485 = vmatpush1.bf16.msra.mxu1 %v887_v49 }
 0x13e   :  { %v224_v5 = vpop.f32.mrb[0].mxu0 }
 0x13f   :  { %v225_v6 = vadd.f32 %v224_v5, %v103_v3  ;;  %v226_v7 = vpop.f32.mrb[1].mxu0 }
 0x140   :  { %v227_v8 = vadd.f32 %v226_v7, %v107_v4  ;;  %v228_v9 = vpop.f32.mrb[2].mxu0 }
 0x141   :  { %v231_v10 = vmax.f32 %v225_v6, 0.0  ;;  %v229_v11 = vpop.f32.mrb[3].mxu0 }
 0x142   :  { %v232_v12 = vmax.f32 %v227_v8, 0.0 }
 0x143   :  { %v780_v14 = vpack.c.bf16 %v231_v10, %v231_v10 }
 0x144   :  { %v781_v13 = vpack.c.bf16 %v232_v12, %v232_v12 }
 0x146   :  { %486 = vmatprep.mubr.bf16.mxu1 %v781_v13 }
 0x147   :  { %487 = vmatmul.mubr.bf16.vlgmr.msra.gmra.mrb[0].mxu1 %v780_v14 }
 0x21a   :  { %v488_v22 = vpop.f32.mrb[0].mxu1 }
 0x21b   :  { %v489_v23 = vadd.f32 %v488_v22, %v280_v20  ;;  %v490_v24 = vpop.f32.mrb[1].mxu1 }
 0x21c   :  { %v491_v25 = vadd.f32 %v490_v24, %v284_v21  ;;  %v492_v26 = vpop.f32.mrb[2].mxu1 }
 0x21d   :  { %v495_v27 = vmax.f32 %v489_v23, 0.0  ;;  %v493_v28 = vpop.f32.mrb[3].mxu1 }
 0x21e   :  { %v496_v29 = vmax.f32 %v491_v25, 0.0 }
 0x21f   :  { %v782_v31 = vpack.c.bf16 %v495_v27, %v495_v27 }
 0x220   :  { %v783_v30 = vpack.c.bf16 %v496_v29, %v496_v29 }
 0x222   :  { %681 = vmatprep.mubr.bf16.mxu0 %v783_v30 }
 0x223   :  { %682 = vmatmul.mubr.bf16.vlgmr.msra.gmra.mrb[4].mxu0 %v782_v31 }
 0x2f6   :  { %v800_v32 = vpop.f32.mrb[4].mxu0 }
 0x2f7   :  { %v801_v34 = vpop.f32.mrb[5].mxu0 }
 0x2f8   :  { %v802_v35 = vadd.f32 %v801_v34, %v800_v32  ;;  %v803_v36 = vpop.f32.mrb[6].mxu0 }
 0x2f9   :  { %v804_v37 = vpop.f32.mrb[7].mxu0 }
 0x2fa   :  { %v684_v38 = vadd.f32 %v802_v35, %v759_v33 }
 0x2fc   :  { %689 = vst [vmem:[#allocation12] sm:$0xff] %v684_v38 }
 0x2fd   :  { %1003 = shalt.err (!%p1000_p8)
}
 0x2fe   :  { %s1004_s6 = scalar_lea.hbm %s1154_s7, 128 }
 0x2ff   :  { %p1005_p9 = scmp.ne.s32.totalorder %s1154_s7, %s1004_s6  ;;  %p1008_p10 = scmp.lt.u32.totalorder %s1004_s6, %s1154_s7 }
 0x301   :  { %p1010_p11 = pnand %p1008_p10, %p1005_p9 }
 0x303   :  { %1013 = shalt.err (!%p1010_p11)
}
 0x304   :  { %699 = dma.vmem_to_hbm [thread:$0]  %s697_s30, 128, %s1154_s7, [#allocation6]  }
 0x305   :  { %1020 = dma.done.wait [#allocation6], 128  }
 0x306   :  { %1021 = vsyncadd [#allocation6], 4294967168 }
 0x307   :  { %703 = vsyncpa [#allocation5], 1 }
 0x308   :  { %704 = vsyncpa [#allocation8], 1 }
 0x309   :  { %705 = vsyncpa [#allocation11], 1 }
 0x30a   :  { %706 = vsyncpa [#allocation6], 1 }

</bundles_post_ra>
